<compile_context>
chip_gen: v7x
topology: tpu7x:2x2x1
jax: 0.10.0
libtpu: 0.0.40
codegen_flags: <defaults>
</compile_context>

<pallas_src>
import functools

import jax
import jax.numpy as jnp
from jax.experimental import pallas as pl
from jax.experimental.pallas import tpu as pltpu


def _self_output_kernel(x_ref, w_ref, vec_ref, res_ref, o_ref, *, eps):
    # Dense: x @ W^T  (MXU, f32 accumulation; x / W may be bf16).
    y = jnp.dot(x_ref[...], w_ref[...], preferred_element_type=jnp.float32)

    vec = vec_ref[...].astype(jnp.float32)     # (3, H): bias | gamma | beta
    bias = vec[0:1, :]
    gamma = vec[1:2, :]
    beta = vec[2:3, :]

    # Dropout: identity in eval mode.
    # TODO(synk): training-mode dropout (pltpu.prng_seed/prng_random_bits mask)
    # not emitted; module is evaluated in inference mode.

    # Residual add + LayerNorm, all in f32.
    z = y + bias + res_ref[...].astype(jnp.float32)
    mean = jnp.mean(z, axis=-1, keepdims=True)
    centered = z - mean
    var = jnp.mean(centered * centered, axis=-1, keepdims=True)
    norm = centered * jax.lax.rsqrt(var + eps)
    o_ref[...] = (norm * gamma + beta).astype(o_ref.dtype)


def _round_up(x, m):
    return (x + m - 1) // m * m


def anti_self_output(hidden_states, input_tensor, params, *, eps=1e-12,
                     row_tile=512, compute_dtype=jnp.bfloat16):
    """hidden_states, input_tensor: (B, S, H).  params: dict of dense/LN."""
    B, S, H = hidden_states.shape
    M = B * S
    out_dtype = hidden_states.dtype

    # Streamed operands in compute_dtype (bf16 by default: native MXU inputs,
    # half the HBM bytes on this memory-bound op).
    x = hidden_states.reshape(M, H).astype(compute_dtype)
    res = input_tensor.reshape(M, H).astype(compute_dtype)
    # PyTorch-style weight (out, in) -> (in, out) so the kernel does x @ W^T.
    w_t = params["dense_w"].T.astype(compute_dtype)                 # (H, H)
    # Pack bias / LN gamma / LN beta into one small f32 operand.
    vec = jnp.stack(
        [params["dense_b"], params["ln_w"], params["ln_b"]], axis=0
    ).astype(jnp.float32)                                           # (3, H)

    # Row tile: 8-aligned (sublane), capped by the (padded) row count.
    tm = _round_up(min(row_tile, _round_up(M, 8)), 8)
    M_pad = _round_up(M, tm)
    if M_pad != M:
        pad = ((0, M_pad - M), (0, 0))
        x = jnp.pad(x, pad)
        res = jnp.pad(res, pad)
    grid = (M_pad // tm,)

    # Scoped-VMEM budget from the real footprint (double-buffered streams +
    # double-buffered resident weight), with headroom; stays well under the
    # 64 MiB/TC v7x physical limit at BERT-sized H with the default tile.
    in_bytes = jnp.dtype(compute_dtype).itemsize
    out_bytes = jnp.dtype(out_dtype).itemsize
    est = (2 * tm * H * (2 * in_bytes + out_bytes)     # x, res, out
           + 2 * H * H * in_bytes                      # W^T
           + 2 * 3 * H * 4)                            # packed vectors
    vmem_limit = int(min(100 * 1024 * 1024,
                         max(32 * 1024 * 1024, est * 3 // 2)))

    kernel = functools.partial(_self_output_kernel, eps=eps)

    out = pl.pallas_call(
        kernel,
        out_shape=jax.ShapeDtypeStruct((M_pad, H), out_dtype),
        grid_spec=pltpu.PrefetchScalarGridSpec(
            num_scalar_prefetch=0,
            grid=grid,
            in_specs=[
                pl.BlockSpec((tm, H), lambda i: (i, 0)),   # x rows (streamed)
                pl.BlockSpec((H, H), lambda i: (0, 0)),    # W^T (resident)
                pl.BlockSpec((3, H), lambda i: (0, 0)),    # bias|gamma|beta
                pl.BlockSpec((tm, H), lambda i: (i, 0)),   # residual rows
            ],
            out_specs=pl.BlockSpec((tm, H), lambda i: (i, 0)),
        ),
        compiler_params=pltpu.CompilerParams(
            dimension_semantics=("parallel",),
            vmem_limit_bytes=vmem_limit),
    )(x, w_t, vec, res)

    return out[:M].reshape(B, S, H)


def init_params(key, hidden_size):
    k_w, k_b = jax.random.split(key)
    scale = 1.0 / jnp.sqrt(hidden_size)
    return {
        "dense_w": jax.random.uniform(k_w, (hidden_size, hidden_size),
                                      jnp.float32, -scale, scale),
        "dense_b": jax.random.uniform(k_b, (hidden_size,),
                                      jnp.float32, -scale, scale),
        "ln_w": jnp.ones((hidden_size,), jnp.float32),
        "ln_b": jnp.zeros((hidden_size,), jnp.float32),
    }


def _reference(hidden_states, input_tensor, params, eps=1e-12):
    y = hidden_states @ params["dense_w"].T + params["dense_b"]
    z = y + input_tensor
    mean = z.mean(-1, keepdims=True)
    var = ((z - mean) ** 2).mean(-1, keepdims=True)
    return (z - mean) / jnp.sqrt(var + eps) * params["ln_w"] + params["ln_b"]


if __name__ == "__main__":
    key = jax.random.PRNGKey(0)
    k_p, k_h, k_i = jax.random.split(key, 3)

    batch, seq, hidden = 2, 8, 32
    params = init_params(k_p, hidden)
    hidden_states = jax.random.normal(k_h, (batch, seq, hidden), jnp.float32)
    input_tensor = jax.random.normal(k_i, (batch, seq, hidden), jnp.float32)

    ref = _reference(hidden_states, input_tensor, params)

    # f32 compute path, multi-step grid (row_tile=8 -> grid of 2): tight check.
    out_f32 = anti_self_output(hidden_states, input_tensor, params,
                               row_tile=8, compute_dtype=jnp.float32)
    out_f32 = jax.block_until_ready(out_f32)
    assert out_f32.shape == (batch, seq, hidden)
    assert jnp.allclose(out_f32, ref, atol=1e-5, rtol=1e-5)

    # Default bf16 MXU path: looser tolerance against the f32 reference.
    out = anti_self_output(hidden_states, input_tensor, params)
    out = jax.block_until_ready(out)
    assert out.shape == (batch, seq, hidden)
    assert jnp.allclose(out, ref, atol=3e-2, rtol=3e-2)

    print("KERNEL_OK")
</pallas_src>

<mosaic_0001>
module attributes {stable_mosaic.version = 11 : i64} {
  func.func @_self_output_kernel(%arg0: i32, %arg1: memref<8x32xf32, #tpu.memory_space<vmem>>, %arg2: memref<32x32xf32, #tpu.memory_space<vmem>>, %arg3: memref<3x32xf32, #tpu.memory_space<vmem>>, %arg4: memref<8x32xf32, #tpu.memory_space<vmem>>, %arg5: memref<8x32xf32, #tpu.memory_space<vmem>>) attributes {dimension_semantics = [#tpu.dimension_semantics<parallel>], iteration_bounds = array<i64: 2>, scalar_prefetch = 0 : i64, scratch_operands = 0 : i64, tpu.core_type = #tpu.core_type<tc>, window_params = [{transform_indices = @transform_0, window_bounds = array<i64: 8, 32>}, {pipeline_mode = #tpu.pipeline_mode<synchronous>, transform_indices = @transform_1, window_bounds = array<i64: 32, 32>}, {pipeline_mode = #tpu.pipeline_mode<synchronous>, transform_indices = @transform_2, window_bounds = array<i64: 3, 32>}, {transform_indices = @transform_3, window_bounds = array<i64: 8, 32>}, {transform_indices = @transform_4, window_bounds = array<i64: 8, 32>}]} {
    %c0 = arith.constant 0 : index
    %c0_0 = arith.constant 0 : index
    %0 = vector.load %arg1[%c0, %c0_0] : memref<8x32xf32, #tpu.memory_space<vmem>>, vector<8x32xf32>
    %c0_1 = arith.constant 0 : index
    %c0_2 = arith.constant 0 : index
    %1 = vector.load %arg2[%c0_1, %c0_2] : memref<32x32xf32, #tpu.memory_space<vmem>>, vector<32x32xf32>
    %cst = arith.constant dense<0.000000e+00> : vector<8x32xf32>
    %2 = tpu.matmul %0, %1, %cst {dimension_numbers = #tpu.dot_dimension_numbers<[1], [0], [0], [1], [0, 0, 1, 1], [], []>} : vector<8x32xf32>, vector<32x32xf32>, vector<8x32xf32> -> vector<8x32xf32>
    %c0_3 = arith.constant 0 : index
    %c0_4 = arith.constant 0 : index
    %3 = vector.load %arg3[%c0_3, %c0_4] : memref<3x32xf32, #tpu.memory_space<vmem>>, vector<3x32xf32>
    %4 = vector.extract_strided_slice %3 {offsets = [0, 0], sizes = [1, 32], strides = [1, 1]} : vector<3x32xf32> to vector<1x32xf32>
    %5 = vector.extract_strided_slice %3 {offsets = [1, 0], sizes = [1, 32], strides = [1, 1]} : vector<3x32xf32> to vector<1x32xf32>
    %6 = vector.extract_strided_slice %3 {offsets = [2, 0], sizes = [1, 32], strides = [1, 1]} : vector<3x32xf32> to vector<1x32xf32>
    %7 = vector.broadcast %4 : vector<1x32xf32> to vector<8x32xf32>
    %8 = arith.addf %2, %7 : vector<8x32xf32>
    %c0_5 = arith.constant 0 : index
    %c0_6 = arith.constant 0 : index
    %9 = vector.load %arg4[%c0_5, %c0_6] : memref<8x32xf32, #tpu.memory_space<vmem>>, vector<8x32xf32>
    %10 = arith.addf %8, %9 : vector<8x32xf32>
    %cst_7 = arith.constant dense<0.000000e+00> : vector<8xf32>
    %11 = vector.multi_reduction <add>, %10, %cst_7 [1] : vector<8x32xf32> to vector<8xf32>
    %12 = vector.shape_cast %11 : vector<8xf32> to vector<8x1xf32>
    %cst_8 = arith.constant 3.200000e+01 : f32
    %13 = vector.broadcast %cst_8 : f32 to vector<8x1xf32>
    %14 = arith.divf %12, %13 : vector<8x1xf32>
    %15 = vector.broadcast %14 : vector<8x1xf32> to vector<8x32xf32>
    %16 = arith.subf %10, %15 : vector<8x32xf32>
    %17 = arith.mulf %16, %16 : vector<8x32xf32>
    %cst_9 = arith.constant dense<0.000000e+00> : vector<8xf32>
    %18 = vector.multi_reduction <add>, %17, %cst_9 [1] : vector<8x32xf32> to vector<8xf32>
    %19 = vector.shape_cast %18 : vector<8xf32> to vector<8x1xf32>
    %cst_10 = arith.constant 3.200000e+01 : f32
    %20 = vector.broadcast %cst_10 : f32 to vector<8x1xf32>
    %21 = arith.divf %19, %20 : vector<8x1xf32>
    %cst_11 = arith.constant 9.99999996E-13 : f32
    %22 = vector.broadcast %cst_11 : f32 to vector<8x1xf32>
    %23 = arith.addf %21, %22 : vector<8x1xf32>
    %24 = math.rsqrt %23 : vector<8x1xf32>
    %25 = vector.broadcast %24 : vector<8x1xf32> to vector<8x32xf32>
    %26 = arith.mulf %16, %25 : vector<8x32xf32>
    %27 = vector.broadcast %5 : vector<1x32xf32> to vector<8x32xf32>
    %28 = arith.mulf %26, %27 : vector<8x32xf32>
    %29 = vector.broadcast %6 : vector<1x32xf32> to vector<8x32xf32>
    %30 = arith.addf %28, %29 : vector<8x32xf32>
    %c0_12 = arith.constant 0 : index
    %c0_13 = arith.constant 0 : index
    %31 = vector.load %arg5[%c0_12, %c0_13] : memref<8x32xf32, #tpu.memory_space<vmem>>, vector<8x32xf32>
    tpu.vector_store %arg5[%c0_12, %c0_13], %30 {strides = array<i32>} : memref<8x32xf32, #tpu.memory_space<vmem>>, vector<8x32xf32>,
    return
  }
  func.func @transform_0(%arg0: i32) -> (i32, i32) {
    %c0_i32 = arith.constant 0 : i32
    %c0_i32_0 = arith.constant 0 : i32
    return %arg0, %c0_i32 : i32, i32
  }
  func.func @transform_1(%arg0: i32) -> (i32, i32) {
    %c0_i32 = arith.constant 0 : i32
    %c0_i32_0 = arith.constant 0 : i32
    %c0_i32_1 = arith.constant 0 : i32
    return %c0_i32, %c0_i32_0 : i32, i32
  }
  func.func @transform_2(%arg0: i32) -> (i32, i32) {
    %c0_i32 = arith.constant 0 : i32
    %c0_i32_0 = arith.constant 0 : i32
    %c0_i32_1 = arith.constant 0 : i32
    return %c0_i32, %c0_i32_0 : i32, i32
  }
  func.func @transform_3(%arg0: i32) -> (i32, i32) {
    %c0_i32 = arith.constant 0 : i32
    %c0_i32_0 = arith.constant 0 : i32
    return %arg0, %c0_i32 : i32, i32
  }
  func.func @transform_4(%arg0: i32) -> (i32, i32) {
    %c0_i32 = arith.constant 0 : i32
    %c0_i32_0 = arith.constant 0 : i32
    return %arg0, %c0_i32 : i32, i32
  }
}

</mosaic_0001>

<bundles_post_ra>
// kernel: tpu_custom_call.1
= control target key start
LH: loop header
LB: loop body
LE: loop exit
PB: predicated region body
PF: predicated region fallthrough
CT: control target
= control target key end

     0   :  { %9 = vsyncpa [#allocation3], 0  ;;  %s1047_s0 = inlined_call_operand.hbm [shape: f32[16,32], index: 0, kind: input, shape index: {}]   ;;  %s1048_s1 = inlined_call_operand.hbm [shape: f32[32,32], index: 1, kind: input, shape index: {}]   ;;  %s1049_s2 = inlined_call_operand.vmem [shape: f32[3,32], index: 2, kind: input, shape index: {}]   ;;  %s1050_s3 = inlined_call_operand.hbm [shape: f32[16,32], index: 3, kind: input, shape index: {}]   ;;  %s1051_s4 = inlined_call_operand.hbm [shape: f32[16,32], index: 4, kind: output, shape index: {}]  }
   0x1   :  { %11 = vsyncpa [#allocation3 + $0x1], 0 }
   0x2   :  { %12 = vsyncpa [#allocation6], 0 }
   0x3   :  { %13 = vsyncpa [#allocation4], 0 }
   0x4   :  { %15 = vsyncpa [#allocation4 + $0x1], 0  ;;  %s794_s15 = smov 0   ;;  %s796_s16 = smov 0  }
   0x5   :  { %s798_s17 = smov 0   ;;  %s800_s18 = smov 0  }
   0x6 LB: > { %s815_s19 = sadd.s32 1, %s758_s18   ;;  %s28_s20 = sadd.s32 1, %s754_s17  ;;  %s758_s18 = sphi %s800_s18, %s1074_s18   ;;  %s754_s17 = sphi %s798_s17, %s1073_s17   ;;  %s750_s16 = sphi %s796_s16, %s1072_s16   ;;  %s746_s15 = sphi %s794_s15, %s1071_s15  }
   0x7   : > { %s25_s21 = ssub.s32 %s758_s18, %s815_s19  ;;  %p35_p0 = scmp.ne.s32.totalorder %s754_s17, %s750_s16 }
   0x8   : > { %p26_p1 = scmp.eq.s32.totalorder %s25_s21, 0  ;;  %p36_p2 = scmp.eq.s32.totalorder %s758_s18, 0 }
   0x9   : > { %p553_p4 = scmp.lt.s32.totalorder %s758_s18, 2  ;;  %s175_s23 = sand.u32 1, %s758_s18  }
   0xa   : > { %s826_s22 = scalar_select %p26_p1, %s754_s17, %s28_s20  }
   0xb   : > { %p37_p5 = por %p36_p2, %p35_p0  ;;  %s177_s24 = sand.u32 1, %s754_s17  }
   0xc   : > { %s833_s25 = sshll.u32 %s177_s24, 3  ;;  %s492_s26 = sshll.u32 %s758_s18, 7 }
   0xd   : > { %s841_s29 = scalar_lea.hbm %s1047_s0, %s492_s26  ;;  %s179_s30 = scalar_lea.vmem [#allocation2], %s833_s25 }
   0xe   : > { %s186_s5 = sshll.u32 %s179_s30, 4  ;;  %p844_p6 = pnand %p553_p4, %p37_p5  ;;  %s848_s5 = int_to_ptr.vmem [resolvable:$true] %s186_s5 }
   0xf   : > { %s850_s7 = scalar_lea.sflag [#allocation3], %s175_s23  ;;  %s596_s8 = scalar_lea.hbm %s841_s29, 128 }
  0x10   : > { %p597_p7 = scmp.ne.s32.totalorder %s841_s29, %s596_s8  ;;  %p598_p8 = pneg %p844_p6 }
  0x11   : > { %s601_s11 = scalar_lea.hbm %s1047_s0, 256  ;;  %p602_p11 = scmp.lt.u32.totalorder %s841_s29, %s1047_s0 }
  0x12   : > { %p599_p9 = pnand %p598_p8, %p597_p7  ;;  %p603_p12 = scmp.lt.u32.totalorder %s601_s11, %s596_s8 }
  0x13   : > { %p605_p1 = scmp.lt.u32.totalorder %s596_s8, %s841_s29 }
  0x14   : > { %p600_p10 = pneg %p599_p9  ;;  %p604_p13 = por %p603_p12, %p602_p11 }
  0x16   : > { %p606_p2 = por %p605_p1, %p604_p13 }
  0x18   : > { %p607_p4 = pnand %p606_p2, %p600_p10 }
  0x1a   : > { %610 = shalt.err (!%p607_p4)
}
  0x1b   : > { %s611_s14 = scalar_lea.vmem %s848_s5, 128  ;;  %s760_s20 = smov [#allocation2]  }
  0x1c   : > { %p612_p5 = scmp.ne.s32.totalorder %s848_s5, %s611_s14  ;;  %s616_s21 = sshll.u32 %s760_s20, 4  ;;  %s617_s21 = int_to_ptr.vmem [resolvable:$false] %s616_s21 }
  0x1d   : > { %s618_s23 = scalar_lea.vmem %s617_s21, 256  ;;  %p619_p3 = scmp.lt.s32.totalorder %s848_s5, %s617_s21 }
  0x1e   : > { %p614_p7 = pnand %p612_p5, %p598_p8  ;;  %p620_p11 = scmp.lt.s32.totalorder %s618_s23, %s611_s14 }
  0x20   : > { %p615_p9 = pneg %p614_p7  ;;  %p621_p12 = por %p620_p11, %p619_p3 }
  0x22   : > { %p622_p13 = pnand %p621_p12, %p615_p9 }
  0x24   : > { %625 = shalt.err (!%p622_p13)
}
  0x25   : > { %544 = dma.hbm_to_vmem [thread:$0]  (!%p844_p6), %s841_s29, 128, %s848_s5, %s850_s7  }
  0x26   : > { %s879_s24 = sadd.s32 4294967295, %s758_s18   ;;  %s487_s27 = sadd.s32 4294967294, %s758_s18  }
  0x27   : > { %p41_p3 = scmp.ne.s32.totalorder %s750_s16, %s746_s15  ;;  %p1052_p10 = scmp.eq.s32.totalorder %s879_s24, 0 }
  0x28   : > { %p133_p1 = scmp.eq.s32.totalorder %s879_s24, 1  ;;  %p139_p2 = scmp.eq.s32.totalorder %s487_s27, 1 }
  0x29   : > { %p888_p4 = por %p1052_p10, %p41_p3  ;;  %p488_p5 = scmp.ge.s32.totalorder %s758_s18, 1 }
  0x2a   : > { %p896_p7 = por %p133_p1, %p35_p0  ;;  %p900_p9 = por %p139_p2, %p41_p3 }
  0x2b   : > { %s1058_s28 = scalar_select %p888_p4, 1, 0 }
  0x2c   : > { %s1059_s29 = scalar_select %p896_p7, 1, 0 }
  0x2d   : > { %s1060_s30 = scalar_select %p900_p9, 1, 0 }
  0x2e   : > { %p146_p11 = scmp.lt.s32.totalorder %s758_s18, 3  ;;  %s761_s8 = smov [#allocation5]  }
  0x2f   : > { %s158_s9 = sshll.u32 %s761_s8, 4  ;;  %s914_s12 = scalar_lea.hbm %s1050_s3, %s492_s26  ;;  %s919_s9 = int_to_ptr.vmem [resolvable:$true] %s158_s9 }
  0x30   : > { %p905_p12 = pnand %p488_p5, %p146_p11  ;;  %s197_s13 = scalar_lea.vmem [#allocation7], %s833_s25 }
  0x31   : > { %s204_s14 = sshll.u32 %s197_s13, 4  ;;  %s626_s21 = scalar_lea.hbm %s914_s12, 128  ;;  %s205_s14 = int_to_ptr.vmem [resolvable:$true] %s204_s14 }
  0x32   : > { %s1061_s5 = scalar_select %p905_p12, 1, 0 }
  0x33   : > { %p537_p0 = pneg %p905_p12  ;;  %p627_p3 = scmp.ne.s32.totalorder %s914_s12, %s626_s21 }
  0x34   : > { %s631_s27 = scalar_lea.hbm %s1050_s3, 256  ;;  %p632_p5 = scmp.lt.u32.totalorder %s914_s12, %s1050_s3 }
  0x35   : > { %p923_p13 = pnand %p537_p0, %p1052_p10  ;;  %p629_p1 = pnand %p627_p3, %p598_p8 }
  0x36   : > { %p633_p11 = scmp.lt.u32.totalorder %s631_s27, %s626_s21  ;;  %p635_p0 = scmp.lt.u32.totalorder %s626_s21, %s914_s12 }
  0x37   : > { %s1062_s20 = scalar_select %p923_p13, 1, 0 }
  0x38   : > { %p630_p2 = pneg %p629_p1  ;;  %p634_p9 = por %p633_p11, %p632_p5 }
  0x3a   : > { %p636_p10 = por %p635_p0, %p634_p9 }
  0x3c   : > { %p637_p7 = pnand %p636_p10, %p630_p2 }
  0x3e   : > { %640 = shalt.err (!%p637_p7)
}
  0x3f   : > { %s641_s10 = scalar_lea.vmem %s205_s14, 128  ;;  %s762_s11 = smov [#allocation7]  }
  0x40   : > { %p642_p4 = scmp.ne.s32.totalorder %s205_s14, %s641_s10  ;;  %s646_s13 = sshll.u32 %s762_s11, 4  ;;  %s647_s13 = int_to_ptr.vmem [resolvable:$false] %s646_s13 }
  0x41   : > { %s648_s26 = scalar_lea.vmem %s647_s13, 256  ;;  %p649_p12 = scmp.lt.s32.totalorder %s205_s14, %s647_s13 }
  0x42   : > { %p644_p3 = pnand %p642_p4, %p598_p8  ;;  %p650_p13 = scmp.lt.s32.totalorder %s648_s26, %s641_s10 }
  0x44   : > { %p645_p1 = pneg %p644_p3  ;;  %p651_p5 = por %p650_p13, %p649_p12 }
  0x46   : > { %p652_p11 = pnand %p651_p5, %p645_p1 }
  0x48   : > { %655 = shalt.err (!%p652_p11)
}
  0x49   : > { %547 = dma.hbm_to_vmem [thread:$0]  (!%p844_p6), %s914_s12, 128, %s205_s14, %s850_s7  }
  0x4a   : > { %s656_s27 = scalar_lea.hbm %s1048_s1, 512  ;;  %p1063_p10 = scmp.ne.s32.totalorder %s1062_s20, 0 }
  0x4b   : > { %p657_p8 = scmp.ne.s32.totalorder %s1048_s1, %s656_s27  ;;  %p663_p12 = scmp.lt.u32.totalorder %s656_s27, %s1048_s1 }
  0x4c   : > { %p658_p4 = pneg %p1063_p10 }
  0x4e   : > { %p659_p7 = pnand %p658_p4, %p657_p8 }
  0x50   : > { %p660_p9 = pneg %p659_p7 }
  0x52   : > { %p665_p13 = pnand %p663_p12, %p660_p9 }
  0x54   : > { %668 = shalt.err (!%p665_p13)
}
  0x55   : > { %s669_s6 = scalar_lea.vmem %s919_s9, 512  ;;  %p677_p3 = scmp.lt.s32.totalorder %s919_s9, %s919_s9 }
  0x56   : > { %p670_p6 = scmp.ne.s32.totalorder %s919_s9, %s669_s6  ;;  %p678_p1 = scmp.lt.s32.totalorder %s669_s6, %s669_s6 }
  0x58   : > { %p672_p2 = pnand %p670_p6, %p658_p4  ;;  %p679_p5 = por %p678_p1, %p677_p3 }
  0x5a   : > { %p673_p0 = pneg %p672_p2 }
  0x5c   : > { %p680_p11 = pnand %p679_p5, %p673_p0 }
  0x5e   : > { %683 = shalt.err (!%p680_p11)
}
  0x5f   : > { %s763_s7 = smov 128   ;;  %s764_s12 = smov 8  }
  0x60   : > { %540 = dma.hbm_to_vmem [thread:$0]  (!%p1063_p10), %s1048_s1, 512, %s919_s9, [#allocation6], %s763_s7, %s763_s7, %s764_s12  }
  0x61   : > { %p1064_p8 = scmp.ne.s32.totalorder %s1061_s5, 0 }
  0x62   : > { %s215_s26 = sand.u32 (!%p1064_p8), 1, %s879_s24   ;;  %s217_s21 = sand.u32 (!%p1064_p8), 1, %s750_s16  }
  0x63   : > { %213 = sbr.rel (%p1064_p8) target bundleno = 666 (0x29a), region = 36  ;;  %s974_s23 = sshll.u32 (!%p1064_p8), %s217_s21, 3 }
  0x64   : > { %s216_s27 = scalar_lea.sflag (!%p1064_p8), [#allocation3], %s215_s26  ;;  %s219_s25 = scalar_lea.vmem (!%p1064_p8), [#allocation2], %s974_s23 }
  0x65   : > { %p1065_p4 = scmp.ne.s32.totalorder (!%p1064_p8), %s1058_s28, 0 }
  0x6a   : > { %729 = dma.done.wait (%p1065_p4), %s216_s27, 128  }
  0x6b   : > { %731 = vsyncadd (%p1065_p4), %s216_s27, 4294967168  ;;  %p1066_p10 = scmp.eq.s32.totalorder %s879_s24, 0 }
  0x6d   : > { %733 = dma.done.wait (%p1066_p10), [#allocation6], 512   ;;  %p1067_p7 = pmov %p1066_p10 }
  0x6e   : > { %s232_s5 = scalar_lea.vmem [#allocation7], %s974_s23 }
  0x6f   : > { %735 = vsyncadd (%p1067_p7), [#allocation6], 4294966784 }
  0x70   : > { %737 = dma.done.wait (%p1065_p4), %s216_s27, 128  }
  0x71   : > { %739 = vsyncadd (%p1065_p4), %s216_s27, 4294967168  ;;  %v765_v0 = vmov 0.0|0.0   ;;  %vm766_vm0 = vmmov 0   ;;  %v767_v1 = vmov 0.0   ;;  %v263_v2 = vld [vmem:[#allocation5] sm:$0xff]  ;;  %v264_v3 = vld [vmem:[#allocation5 + $0x8] sm:$0xff]  ;;  %v268_v9 = vlaneseq }
  0x72   : > { %521 = vmatprep.subr.bf16.mxu0 %v765_v0  ;;  %518 = vmatprep.mubr.msk.f32.mxu0 %vm766_vm0, %v767_v1  ;;  %v265_v4 = vld [vmem:[#allocation5 + $0x10] sm:$0xff]  ;;  %v522_v5 = vpack.c.bf16 %v264_v3, %v263_v2  ;;  %v266_v6 = vld [vmem:[#allocation5 + $0x18] sm:$0xff]  ;;  %vm272_vm1 = vcmask 261120   ;;  %v346_v15 = vld [vmem:[%s232_s5] sm:$0xff]  ;;  %s502_s20 = sshll.u32 %s879_s24, 7  ;;  %s261_s8 = scalar_lea.vmem [#allocation8], %s974_s23 }
  0x73   : > { %v525_v7 = vpack.c.bf16 %v266_v6, %v265_v4  ;;  %v262_v8 = vld [vmem:[%s219_s25] sm:$0xff]  ;;  %v269_v10 = vshrl.u32 %v268_v9, 7  ;;  %s387_s10 = sshll.u32 %s261_s8, 4  ;;  %s1001_s7 = scalar_lea.hbm %s1051_s4, %s502_s20  ;;  %s1003_s10 = int_to_ptr.vmem [resolvable:$true] %s387_s10 }
  0x74   : > { %523 = vmatpush3.bf16.msra.mxu0 %v522_v5  ;;  %v267_v12 = vld [vmem:[%s1049_s2] sm:$0x7]  ;;  %s374_s12 = scalar_lea.sflag [#allocation4], %s217_s21  ;;  %s684_s14 = scalar_lea.vmem %s1003_s10, 128 }
  0x75   : > { %524 = vmatprep.subr.bf16.mxu0 %v765_v0  ;;  %v270_v11 = vsub.s32 0, %v269_v10  ;;  %v364_v28 = vsub.s32 1, %v269_v10  ;;  %v369_v29 = vsub.s32 2, %v269_v10  ;;  %p685_p9 = scmp.ne.s32.totalorder %s1003_s10, %s684_s14  ;;  %p1068_p12 = scmp.ne.s32.totalorder %s1059_s29, 0 }
  0x76   : > { %s768_s24 = smov [#allocation8]  }
  0x77   : > { %v271_v13 = vrot.slane %v267_v12, %v270_v11  ;;  %v365_v30 = vrot.slane %v267_v12, %v364_v28  ;;  %v370_v32 = vrot.slane %v267_v12, %v369_v29  ;;  %p686_p13 = pnand %p685_p9, %p1068_p12  ;;  %s688_s13 = sshll.u32 %s768_s24, 4  ;;  %s689_s13 = int_to_ptr.vmem [resolvable:$false] %s688_s13 }
  0x78   : > { %526 = vmatpush3.bf16.msra.mxu0 %v525_v7  ;;  %s690_s26 = scalar_lea.vmem %s689_s13, 256  ;;  %p691_p2 = scmp.lt.s32.totalorder %s1003_s10, %s689_s13 }
  0x79   : > { %p687_p6 = pneg %p686_p13  ;;  %p692_p0 = scmp.lt.s32.totalorder %s690_s26, %s684_s14 }
  0x7b   : > { %519 = vmatmul.mubr.msk.f32.vlgmr.msra.gmra.mrb[0].mxu0 %vm272_vm1, %v262_v8  ;;  %p693_p3 = por %p692_p0, %p691_p2 }
  0x7d   : > { %p694_p1 = pnand %p693_p3, %p687_p6 }
 0x14e   : > { %v342_v14 = vpop.f32.mrb[0].mxu0 }
 0x14f   : > { %v343_v16 = vadd.f32 %v342_v14, %v271_v13  ;;  %v520_v17 = vpop.f32.mrb[1].mxu0 }
 0x151   : > { %v347_v18 = vadd.f32 %v346_v15, %v343_v16 }
 0x153   : > { %v348_v19 = vsel %vm272_vm1, %v347_v18, 0.0 }
 0x154   : > { %349 = vadd.xlane.f32.xlu0 %v348_v19 }
 0x1e1   : > { %v350_v20 = vpop.xlane.xlu0 %349 }
 0x1e2   : > { %v352_v21 = vmul.f32 0.03125, %v350_v20 }
 0x1e4   : > { %v353_v22 = vsub.f32 %v347_v18, %v352_v21 }
 0x1e6   : > { %v354_v23 = vmul.f32 %v353_v22, %v353_v22 }
 0x1e8   : > { %v355_v24 = vsel %vm272_vm1, %v354_v23, 0.0 }
 0x1e9   : > { %356 = vadd.xlane.f32.xlu0 %v355_v24 }
 0x276   : > { %v357_v25 = vpop.xlane.xlu0 %356 }
 0x277   : > { %v358_v26 = vmul.f32 0.03125, %v357_v25 }
 0x279   : > { %v359_v27 = vadd.f32 1e-12, %v358_v26 }
 0x27b   : > { %594 = vrsqrt.f32 %v359_v27 }
 0x285   : > { %v595_v31 = vpop.eup %594 }
 0x286   : > { %v361_v33 = vmul.f32 %v595_v31, %v353_v22 }
 0x288   : > { %v366_v34 = vmul.f32 %v365_v30, %v361_v33 }
 0x28a   : > { %v371_v35 = vadd.f32 %v370_v32, %v366_v34 }
 0x28c   : > { %372 = vst.msk [vmem:[%s261_s8] sm:$0xff] %vm272_vm1, %v371_v35 }
 0x28d   : > { %697 = shalt.err (!%p694_p1)
}
 0x28e   : > { %s698_s21 = scalar_lea.hbm %s1001_s7, 128  ;;  %s702_s25 = scalar_lea.hbm %s1051_s4, 256 }
 0x28f   : > { %p699_p5 = scmp.ne.s32.totalorder %s1001_s7, %s698_s21  ;;  %p703_p4 = scmp.lt.u32.totalorder %s1001_s7, %s1051_s4 }
 0x290   : > { %p704_p10 = scmp.lt.u32.totalorder %s702_s25, %s698_s21  ;;  %p706_p9 = scmp.lt.u32.totalorder %s698_s21, %s1001_s7 }
 0x291   : > { %p700_p11 = pnand %p699_p5, %p1068_p12 }
 0x292   : > { %p705_p7 = por %p704_p10, %p703_p4 }
 0x293   : > { %p701_p8 = pneg %p700_p11 }
 0x294   : > { %p707_p13 = por %p706_p9, %p705_p7 }
 0x296   : > { %p708_p6 = pnand %p707_p13, %p701_p8 }
 0x298   : > { %711 = shalt.err (!%p708_p6)
}
 0x299   : > { %535 = dma.vmem_to_hbm [thread:$0]  (%p1068_p12), %s1003_s10, 128, %s1001_s7, %s374_s12  }
 0x29a PF: > { %s399_s9 = sand.u32 1, %s746_s15   ;;  %p1069_p2 = scmp.ne.s32.totalorder %s1060_s30, 0 }
 0x29b   : > { %p1070_p0 = scmp.ge.s32.totalorder %s758_s18, 2  ;;  %s400_s20 = scalar_lea.sflag [#allocation4], %s399_s9 }
 0x29d   : > { %p549_p3 = pnand %p1070_p0, %p1069_p2 }
 0x29f   : > { %741 = dma.done.wait (!%p549_p3), %s400_s20, 128  }
 0x2a0   : > { %743 = vsyncadd (!%p549_p3), %s400_s20, 4294967168  ;;  %p18_p1 = scmp.ge.s32.totalorder %s815_s19, 4   ;;  %s1071_s15 = smov %s750_s16 }
 0x2a1   : > { %s1072_s16 = smov %s754_s17  ;;  %s1073_s17 = smov %s826_s22 }
 0x2a2   : > { %s1074_s18 = smov %s815_s19  ;;  %20 = sbr.rel (!%p18_p1) target bundleno = 6 (0x6), region = 96 }
 0x2a9   :  { %405 = vsyncpa [#allocation3], 1 }
 0x2aa   :  { %407 = vsyncpa [#allocation3 + $0x1], 1 }
 0x2ab   :  { %408 = vsyncpa [#allocation6], 1 }
 0x2ac   :  { %409 = vsyncpa [#allocation4], 1 }
 0x2ad   :  { %411 = vsyncpa [#allocation4 + $0x1], 1 }

</bundles_post_ra>
